<compile_context>
chip_gen: v7x
topology: tpu7x:2x2x1
jax: 0.10.0
libtpu: 0.0.40
codegen_flags: <defaults>
</compile_context>

<pallas_src>
import functools

import jax
import jax.numpy as jnp
from jax import lax
from jax.experimental import pallas as pl
from jax.experimental.pallas import tpu as pltpu

EPS = 1e-5

# Lane-aligned (padded) head dimensions.
D_IN = 512     # resnet18 feature dim (already lane-aligned)
D1P = 256      # fc1 out: 200 -> 256
D2P = 128      # fc2 out: 100 -> 128
D3P = 128      # fc3 out: 2   -> 128
D1, D2, D3 = 200, 100, 2


def _round_up(n, m):
    return ((n + m - 1) // m) * m


# ----------------------------------------------------------------------------
# Pallas kernel: fused MLP head with a batch-tiled grid.
#   grid = (n_tiles,)  over batch tiles of `tm` rows (reduction axis).
#   Per tile : h1 = x_tile @ W1 (MXU, f32 acc), store into resident scratch,
#              accumulate per-channel sum / sum-of-squares.
#   Last tile: form BN1 scale/shift, apply + ReLU, mask padded rows, fc2,
#              BN2 (whole batch is VMEM-resident), ReLU, fc3 -> output.
# ----------------------------------------------------------------------------
def _head_kernel(x_ref, w1_ref, g1_ref, b1_ref, w2_ref, g2_ref, b2_ref, w3_ref,
                 o_ref, h1_ref, s1_ref, ss1_ref, *, true_b, tm):
    t = pl.program_id(0)

    @pl.when(t == 0)
    def _():
        s1_ref[...] = jnp.zeros_like(s1_ref)
        ss1_ref[...] = jnp.zeros_like(ss1_ref)

    # fc1 on this batch tile: (tm, 512) @ (512, 256), f32 accumulation on the MXU.
    h1 = jnp.dot(x_ref[...], w1_ref[...], preferred_element_type=jnp.float32)
    row0 = pl.multiple_of(t * tm, tm)
    h1_ref[pl.ds(row0, tm), :] = h1
    # Padded batch rows are exactly zero in feats -> contribute 0 to both sums,
    # so dividing by 1/true_b later keeps the batch statistics exact.
    s1_ref[...] += jnp.sum(h1, axis=0, keepdims=True)
    ss1_ref[...] += jnp.sum(h1 * h1, axis=0, keepdims=True)

    @pl.when(t == pl.num_programs(0) - 1)
    def _():
        inv_b = jnp.float32(1.0 / true_b)

        def _scale_shift(s, ss, g, b):
            # Training-mode BatchNorm1d (biased variance) folded into one
            # per-channel scale/shift so each (B, N) pass is a single mul-add.
            mu = s * inv_b
            var = jnp.maximum(ss * inv_b - mu * mu, 0.0)   # guard fp cancellation
            scale = g * lax.rsqrt(var + EPS)               # (1, N)
            shift = b - mu * scale                         # (1, N)
            return scale, shift

        sc1, sh1 = _scale_shift(s1_ref[...], ss1_ref[...], g1_ref[...], b1_ref[...])
        h = jnp.maximum(h1_ref[...] * sc1 + sh1, 0.0)      # (B_pad, 256) f32

        # Zero the padded batch rows (BN shift makes them nonzero) so they do not
        # pollute the BN2 statistics.
        b_pad = h.shape[0]
        if b_pad != true_b:
            rows = lax.broadcasted_iota(jnp.int32, (b_pad, 1), 0)
            h = jnp.where(rows < true_b, h, 0.0)

        # fc2: (B_pad, 256) @ (256, 128)  (cols 100..127 are zero padding)
        h2 = jnp.dot(h.astype(w2_ref.dtype), w2_ref[...],
                     preferred_element_type=jnp.float32)
        s2 = jnp.sum(h2, axis=0, keepdims=True)
        ss2 = jnp.sum(h2 * h2, axis=0, keepdims=True)
        sc2, sh2 = _scale_shift(s2, ss2, g2_ref[...], b2_ref[...])
        h2 = jnp.maximum(h2 * sc2 + sh2, 0.0)

        # fc3: (B_pad, 128) @ (128, 128)  (only the first 2 output cols non-zero)
        o_ref[...] = jnp.dot(h2.astype(w3_ref.dtype), w3_ref[...],
                             preferred_element_type=jnp.float32)


def _pad2(w, rows, cols):
    return jnp.pad(w.astype(jnp.float32),
                   ((0, rows - w.shape[0]), (0, cols - w.shape[1])))


def _pad1(v, n):
    # gamma/beta padding is exactly 0 -> padded channels stay identically zero.
    return jnp.pad(v.astype(jnp.float32), (0, n - v.shape[0])).reshape(1, -1)


def _vmem_capacity_bytes():
    try:
        info = pltpu.get_tpu_info()
        cap = getattr(info, "vmem_capacity_bytes", None)
        if cap:
            return int(cap)
    except Exception:
        pass
    return 64 << 20   # v7x-safe fallback (smallest VMEM per TensorCore)


def ts_head(feats, head_params, use_bf16=True, tile_m=512):
    """feats: (B, 512) float32 -> (B, 2) float32 via one fused Pallas kernel."""
    B = feats.shape[0]
    w1, g1, b1, w2, g2, b2, w3 = head_params

    mm_dtype = jnp.bfloat16 if use_bf16 else jnp.float32
    dt_bytes = 2 if use_bf16 else 4
    sub = 16 if use_bf16 else 8          # sublane pack for the matmul dtype

    # Batch tiling: tm rows per grid step, batch zero-padded to a tile multiple.
    tm = _round_up(min(tile_m, _round_up(B, sub)), sub)
    b_pad = _round_up(B, tm)
    n_tiles = b_pad // tm

    feats_p = feats.astype(mm_dtype)
    if b_pad != B:
        feats_p = jnp.pad(feats_p, ((0, b_pad - B), (0, 0)))   # zero rows

    w1p = _pad2(w1, D_IN, D1P).astype(mm_dtype)
    w2p = _pad2(w2, D1P, D2P).astype(mm_dtype)
    w3p = _pad2(w3, D2P, D3P).astype(mm_dtype)
    g1p, b1p = _pad1(g1, D1P), _pad1(b1, D1P)
    g2p, b2p = _pad1(g2, D2P), _pad1(b2, D2P)

    kernel = functools.partial(_head_kernel, true_b=B, tm=tm)

    in_specs = [
        pl.BlockSpec((tm, D_IN), lambda t: (t, 0)),     # feats tile (pipelined DMA)
        pl.BlockSpec((D_IN, D1P), lambda t: (0, 0)),    # w1  (VMEM-resident)
        pl.BlockSpec((1, D1P), lambda t: (0, 0)),       # bn1 gamma
        pl.BlockSpec((1, D1P), lambda t: (0, 0)),       # bn1 beta
        pl.BlockSpec((D1P, D2P), lambda t: (0, 0)),     # w2
        pl.BlockSpec((1, D2P), lambda t: (0, 0)),       # bn2 gamma
        pl.BlockSpec((1, D2P), lambda t: (0, 0)),       # bn2 beta
        pl.BlockSpec((D2P, D3P), lambda t: (0, 0)),     # w3
    ]
    # Output stays resident across the (reduction) grid; written at the last step.
    out_spec = pl.BlockSpec((b_pad, D3P), lambda t: (0, 0))

    scratch = [
        pltpu.VMEM((b_pad, D1P), jnp.float32),   # resident h1 (fc1 output, all tiles)
        pltpu.VMEM((1, D1P), jnp.float32),       # per-channel sum
        pltpu.VMEM((1, D1P), jnp.float32),       # per-channel sum of squares
    ]

    # VMEM budget: actual working set + headroom, capped at 80% of this
    # generation's physical VMEM (64 MiB on v7x, 128 MiB on v5e/v6e).
    weight_bytes = ((D_IN * D1P + D1P * D2P + D2P * D3P) * dt_bytes
                    + 4 * (D1P + D2P) * 4)
    stream_bytes = 2 * tm * D_IN * dt_bytes                     # double-buffered feats
    resident_bytes = b_pad * (D1P + D3P) * 4 + 2 * D1P * 4      # h1 scratch + out + stats
    need = weight_bytes + stream_bytes + resident_bytes
    cap = _vmem_capacity_bytes()
    vmem_bytes = int(min(int(cap * 0.8), max(16 << 20, 2 * need)))

    cost = pl.CostEstimate(
        flops=2 * b_pad * (D_IN * D1P + D1P * D2P + D2P * D3P),
        transcendentals=D1P + D2P,                               # rsqrt per BN channel
        bytes_accessed=weight_bytes + b_pad * D_IN * dt_bytes + b_pad * D3P * 4,
    )

    out = pl.pallas_call(
        kernel,
        out_shape=jax.ShapeDtypeStruct((b_pad, D3P), jnp.float32),
        grid=(n_tiles,),
        in_specs=in_specs,
        out_specs=out_spec,
        scratch_shapes=scratch,
        compiler_params=pltpu.CompilerParams(
            dimension_semantics=("arbitrary",),   # BN stats reduce over the batch grid
            vmem_limit_bytes=vmem_bytes),
        cost_estimate=cost,
    )(feats_p, w1p, g1p, b1p, w2p, g2p, b2p, w3p)
    return out[:B, :D3]                                          # (B, 2)


# ----------------------------------------------------------------------------
# ResNet18 backbone (plain-JAX glue), NHWC layout, eval-mode BN folded into conv.
# ----------------------------------------------------------------------------
def _fold_conv_bn(w_oihw, bn):
    """Fold eval-mode BN into the conv: returns (HWIO weight, per-channel bias)."""
    gamma, beta, mean, var = bn
    s = gamma * lax.rsqrt(var + EPS)                 # (O,)
    w = jnp.transpose(w_oihw, (2, 3, 1, 0))          # OIHW -> HWIO
    w = w * s.reshape(1, 1, 1, -1)
    b = beta - mean * s
    return w, b


def fold_fe_params(fe):
    folded = {"conv1": _fold_conv_bn(fe["conv1"], fe["bn1"]), "layers": []}
    for layer in fe["layers"]:
        fl = []
        for blk in layer:
            fb = {"conv1": _fold_conv_bn(blk["conv1"], blk["bn1"]),
                  "conv2": _fold_conv_bn(blk["conv2"], blk["bn2"])}
            if "down_conv" in blk:
                fb["down"] = _fold_conv_bn(blk["down_conv"], blk["down_bn"])
            fl.append(fb)
        folded["layers"].append(fl)
    return folded


def _conv2d_nhwc(x, w, stride, padding):
    return lax.conv_general_dilated(
        x, w,
        window_strides=(stride, stride),
        padding=[(padding, padding), (padding, padding)],
        dimension_numbers=("NHWC", "HWIO", "NHWC"),
    )


def _maxpool_3x3_s2_p1(x):
    return lax.reduce_window(
        x, -jnp.inf, lax.max,
        window_dimensions=(1, 3, 3, 1),
        window_strides=(1, 2, 2, 1),
        padding=[(0, 0), (1, 1), (1, 1), (0, 0)],
    )


def _basic_block(x, p, stride):
    w1, b1 = p["conv1"]
    w2, b2 = p["conv2"]
    out = jnp.maximum(_conv2d_nhwc(x, w1, stride, 1) + b1, 0.0)
    out = _conv2d_nhwc(out, w2, 1, 1) + b2
    if "down" in p:
        wd, bd = p["down"]
        identity = _conv2d_nhwc(x, wd, stride, 0) + bd
    else:
        identity = x
    return jnp.maximum(out + identity, 0.0)


def resnet18_features(x_nchw, fe_folded):
    x = jnp.transpose(x_nchw, (0, 2, 3, 1))          # NCHW (PyTorch) -> NHWC once
    w, b = fe_folded["conv1"]
    x = jnp.maximum(_conv2d_nhwc(x, w, 2, 3) + b, 0.0)
    x = _maxpool_3x3_s2_p1(x)
    for li, layer in enumerate(fe_folded["layers"]):
        for bi, block in enumerate(layer):
            stride = 2 if (li > 0 and bi == 0) else 1
            x = _basic_block(x, block, stride)
    return jnp.mean(x, axis=(1, 2))                  # adaptive avg pool -> (B, 512)


def ts_net_forward(x, fe_folded, head_params, use_bf16=True):
    feats = resnet18_features(x, fe_folded)          # fix_fe=True: fe in eval mode
    return ts_head(feats, head_params, use_bf16=use_bf16)


# ----------------------------------------------------------------------------
# Deterministic parameter construction (synthetic, no checkpoint).
# ----------------------------------------------------------------------------
class _KeyGen:
    def __init__(self, seed):
        self.key = jax.random.PRNGKey(seed)

    def __call__(self):
        self.key, sub = jax.random.split(self.key)
        return sub


def _conv_w(kg, oc, ic, k):
    fan_in = ic * k * k
    return jax.random.normal(kg(), (oc, ic, k, k), jnp.float32) / jnp.sqrt(float(fan_in))


def _bn_p(kg, c):
    gamma = 1.0 + 0.1 * jax.random.normal(kg(), (c,), jnp.float32)
    beta = 0.1 * jax.random.normal(kg(), (c,), jnp.float32)
    mean = 0.1 * jax.random.normal(kg(), (c,), jnp.float32)
    var = 1.0 + 0.5 * jax.random.uniform(kg(), (c,), jnp.float32)
    return (gamma, beta, mean, var)


def _block_p(kg, cin, cout, downsample):
    p = {
        "conv1": _conv_w(kg, cout, cin, 3),
        "bn1": _bn_p(kg, cout),
        "conv2": _conv_w(kg, cout, cout, 3),
        "bn2": _bn_p(kg, cout),
    }
    if downsample:
        p["down_conv"] = _conv_w(kg, cout, cin, 1)
        p["down_bn"] = _bn_p(kg, cout)
    return p


def make_params(seed=0):
    kg = _KeyGen(seed)
    fe = {
        "conv1": _conv_w(kg, 64, 3, 7),
        "bn1": _bn_p(kg, 64),
        "layers": [],
    }
    chans = [(64, 64), (64, 128), (128, 256), (256, 512)]
    for li, (cin, cout) in enumerate(chans):
        blocks = [
            _block_p(kg, cin, cout, downsample=(li > 0)),
            _block_p(kg, cout, cout, downsample=False),
        ]
        fe["layers"].append(blocks)

    def _fc(kg, din, dout):  # stored already transposed: (din, dout)
        return jax.random.normal(kg(), (din, dout), jnp.float32) / jnp.sqrt(float(din))

    head = (
        _fc(kg, 512, 200),                                         # ts_fc1 (bias=False)
        1.0 + 0.1 * jax.random.normal(kg(), (200,), jnp.float32),  # ts_bn1 gamma
        0.1 * jax.random.normal(kg(), (200,), jnp.float32),        # ts_bn1 beta
        _fc(kg, 200, 100),                                         # ts_fc2
        1.0 + 0.1 * jax.random.normal(kg(), (100,), jnp.float32),  # ts_bn2 gamma
        0.1 * jax.random.normal(kg(), (100,), jnp.float32),        # ts_bn2 beta
        _fc(kg, 100, 2),                                           # ts_fc3
    )
    return fe, head


if __name__ == "__main__":
    fe_params, head_params = make_params(seed=0)
    fe_folded = fold_fe_params(fe_params)            # fold eval-mode BN into convs once
    x = jax.random.normal(jax.random.PRNGKey(0), (2, 3, 32, 32), jnp.float32)

    fwd = jax.jit(functools.partial(ts_net_forward,
                                    fe_folded=fe_folded,
                                    head_params=head_params,
                                    use_bf16=True))
    out = fwd(x)
    out = jax.block_until_ready(out)
    assert out.shape == (2, 2) and out.dtype == jnp.float32
    assert bool(jnp.all(jnp.isfinite(out)))
    print("KERNEL_OK")
</pallas_src>

<mosaic_0001>
module attributes {stable_mosaic.version = 11 : i64} {
  func.func @_head_kernel(%arg0: i32, %arg1: memref<16x512xbf16, #tpu.memory_space<vmem>>, %arg2: memref<512x256xbf16, #tpu.memory_space<vmem>>, %arg3: memref<1x256xf32, #tpu.memory_space<vmem>>, %arg4: memref<1x256xf32, #tpu.memory_space<vmem>>, %arg5: memref<256x128xbf16, #tpu.memory_space<vmem>>, %arg6: memref<1x128xf32, #tpu.memory_space<vmem>>, %arg7: memref<1x128xf32, #tpu.memory_space<vmem>>, %arg8: memref<128x128xbf16, #tpu.memory_space<vmem>>, %arg9: memref<16x128xf32, #tpu.memory_space<vmem>>, %arg10: memref<16x256xf32, #tpu.memory_space<vmem>>, %arg11: memref<1x256xf32, #tpu.memory_space<vmem>>, %arg12: memref<1x256xf32, #tpu.memory_space<vmem>>) attributes {dimension_semantics = [#tpu.dimension_semantics<arbitrary>], iteration_bounds = array<i64: 1>, scalar_prefetch = 0 : i64, scratch_operands = 3 : i64, tpu.core_type = #tpu.core_type<tc>, window_params = [{transform_indices = @transform_0, window_bounds = array<i64: 16, 512>}, {pipeline_mode = #tpu.pipeline_mode<synchronous>, transform_indices = @transform_1, window_bounds = array<i64: 512, 256>}, {pipeline_mode = #tpu.pipeline_mode<synchronous>, transform_indices = @transform_2, window_bounds = array<i64: 1, 256>}, {pipeline_mode = #tpu.pipeline_mode<synchronous>, transform_indices = @transform_3, window_bounds = array<i64: 1, 256>}, {pipeline_mode = #tpu.pipeline_mode<synchronous>, transform_indices = @transform_4, window_bounds = array<i64: 256, 128>}, {pipeline_mode = #tpu.pipeline_mode<synchronous>, transform_indices = @transform_5, window_bounds = array<i64: 1, 128>}, {pipeline_mode = #tpu.pipeline_mode<synchronous>, transform_indices = @transform_6, window_bounds = array<i64: 1, 128>}, {pipeline_mode = #tpu.pipeline_mode<synchronous>, transform_indices = @transform_7, window_bounds = array<i64: 128, 128>}, {pipeline_mode = #tpu.pipeline_mode<synchronous>, transform_indices = @transform_8, window_bounds = array<i64: 16, 128>}]} {
    %c0_i32 = arith.constant 0 : i32
    %0 = arith.cmpi eq, %arg0, %c0_i32 : i32
    %1 = arith.extui %0 : i1 to i32
    %c0_i32_0 = arith.constant 0 : i32
    %2 = arith.cmpi ne, %1, %c0_i32_0 : i32
    scf.if %2 {
      %cst_17 = arith.constant 0.000000e+00 : f32
      %24 = vector.broadcast %cst_17 : f32 to vector<1x256xf32>
      %c0_18 = arith.constant 0 : index
      %c0_19 = arith.constant 0 : index
      %25 = vector.load %arg11[%c0_18, %c0_19] : memref<1x256xf32, #tpu.memory_space<vmem>>, vector<1x256xf32>
      tpu.vector_store %arg11[%c0_18, %c0_19], %24 {strides = array<i32>} : memref<1x256xf32, #tpu.memory_space<vmem>>, vector<1x256xf32>,
      %cst_20 = arith.constant 0.000000e+00 : f32
      %26 = vector.broadcast %cst_20 : f32 to vector<1x256xf32>
      %c0_21 = arith.constant 0 : index
      %c0_22 = arith.constant 0 : index
      %27 = vector.load %arg12[%c0_21, %c0_22] : memref<1x256xf32, #tpu.memory_space<vmem>>, vector<1x256xf32>
      tpu.vector_store %arg12[%c0_21, %c0_22], %26 {strides = array<i32>} : memref<1x256xf32, #tpu.memory_space<vmem>>, vector<1x256xf32>,
    } else {
    }
    %c0 = arith.constant 0 : index
    %c0_1 = arith.constant 0 : index
    %3 = vector.load %arg1[%c0, %c0_1] : memref<16x512xbf16, #tpu.memory_space<vmem>>, vector<16x512xbf16>
    %c0_2 = arith.constant 0 : index
    %c0_3 = arith.constant 0 : index
    %4 = vector.load %arg2[%c0_2, %c0_3] : memref<512x256xbf16, #tpu.memory_space<vmem>>, vector<512x256xbf16>
    %cst = arith.constant dense<0.000000e+00> : vector<16x256xf32>
    %5 = tpu.matmul %3, %4, %cst {dimension_numbers = #tpu.dot_dimension_numbers<[1], [0], [0], [1], [0, 0, 1, 1], [], []>} : vector<16x512xbf16>, vector<512x256xbf16>, vector<16x256xf32> -> vector<16x256xf32>
    %c16_i32 = arith.constant 16 : i32
    %6 = arith.muli %arg0, %c16_i32 : i32
    %7 = tpu.assume_multiple %6, 16 : i32
    %8 = arith.index_cast %7 : i32 to index
    %c0_4 = arith.constant 0 : index
    %9 = vector.load %arg10[%8, %c0_4] : memref<16x256xf32, #tpu.memory_space<vmem>>, vector<16x256xf32>
    tpu.vector_store %arg10[%8, %c0_4], %5 {strides = array<i32>} : memref<16x256xf32, #tpu.memory_space<vmem>>, vector<16x256xf32>,
    %c0_5 = arith.constant 0 : index
    %c0_6 = arith.constant 0 : index
    %10 = vector.load %arg11[%c0_5, %c0_6] : memref<1x256xf32, #tpu.memory_space<vmem>>, vector<1x256xf32>
    %cst_7 = arith.constant dense<0.000000e+00> : vector<256xf32>
    %11 = vector.multi_reduction <add>, %5, %cst_7 [0] : vector<16x256xf32> to vector<256xf32>
    %12 = vector.shape_cast %11 : vector<256xf32> to vector<1x256xf32>
    %13 = arith.addf %10, %12 : vector<1x256xf32>
    %c0_8 = arith.constant 0 : index
    %c0_9 = arith.constant 0 : index
    %14 = vector.load %arg11[%c0_8, %c0_9] : memref<1x256xf32, #tpu.memory_space<vmem>>, vector<1x256xf32>
    tpu.vector_store %arg11[%c0_8, %c0_9], %13 {strides = array<i32>} : memref<1x256xf32, #tpu.memory_space<vmem>>, vector<1x256xf32>,
    %c0_10 = arith.constant 0 : index
    %c0_11 = arith.constant 0 : index
    %15 = vector.load %arg12[%c0_10, %c0_11] : memref<1x256xf32, #tpu.memory_space<vmem>>, vector<1x256xf32>
    %16 = arith.mulf %5, %5 : vector<16x256xf32>
    %cst_12 = arith.constant dense<0.000000e+00> : vector<256xf32>
    %17 = vector.multi_reduction <add>, %16, %cst_12 [0] : vector<16x256xf32> to vector<256xf32>
    %18 = vector.shape_cast %17 : vector<256xf32> to vector<1x256xf32>
    %19 = arith.addf %15, %18 : vector<1x256xf32>
    %c0_13 = arith.constant 0 : index
    %c0_14 = arith.constant 0 : index
    %20 = vector.load %arg12[%c0_13, %c0_14] : memref<1x256xf32, #tpu.memory_space<vmem>>, vector<1x256xf32>
    tpu.vector_store %arg12[%c0_13, %c0_14], %19 {strides = array<i32>} : memref<1x256xf32, #tpu.memory_space<vmem>>, vector<1x256xf32>,
    %c0_i32_15 = arith.constant 0 : i32
    %21 = arith.cmpi eq, %arg0, %c0_i32_15 : i32
    %22 = arith.extui %21 : i1 to i32
    %c0_i32_16 = arith.constant 0 : i32
    %23 = arith.cmpi ne, %22, %c0_i32_16 : i32
    scf.if %23 {
      %c0_17 = arith.constant 0 : index
      %c0_18 = arith.constant 0 : index
      %24 = vector.load %arg11[%c0_17, %c0_18] : memref<1x256xf32, #tpu.memory_space<vmem>>, vector<1x256xf32>
      %c0_19 = arith.constant 0 : index
      %c0_20 = arith.constant 0 : index
      %25 = vector.load %arg12[%c0_19, %c0_20] : memref<1x256xf32, #tpu.memory_space<vmem>>, vector<1x256xf32>
      %c0_21 = arith.constant 0 : index
      %c0_22 = arith.constant 0 : index
      %26 = vector.load %arg3[%c0_21, %c0_22] : memref<1x256xf32, #tpu.memory_space<vmem>>, vector<1x256xf32>
      %c0_23 = arith.constant 0 : index
      %c0_24 = arith.constant 0 : index
      %27 = vector.load %arg4[%c0_23, %c0_24] : memref<1x256xf32, #tpu.memory_space<vmem>>, vector<1x256xf32>
      %cst_25 = arith.constant 5.000000e-01 : f32
      %28 = vector.broadcast %cst_25 : f32 to vector<1x256xf32>
      %29 = arith.mulf %24, %28 : vector<1x256xf32>
      %cst_26 = arith.constant 5.000000e-01 : f32
      %30 = vector.broadcast %cst_26 : f32 to vector<1x256xf32>
      %31 = arith.mulf %25, %30 : vector<1x256xf32>
      %32 = arith.mulf %29, %29 : vector<1x256xf32>
      %33 = arith.subf %31, %32 : vector<1x256xf32>
      %cst_27 = arith.constant 0.000000e+00 : f32
      %34 = vector.broadcast %cst_27 : f32 to vector<1x256xf32>
      %35 = arith.maximumf %33, %34 : vector<1x256xf32>
      %cst_28 = arith.constant 9.99999974E-6 : f32
      %36 = vector.broadcast %cst_28 : f32 to vector<1x256xf32>
      %37 = arith.addf %35, %36 : vector<1x256xf32>
      %38 = math.rsqrt %37 : vector<1x256xf32>
      %39 = arith.mulf %26, %38 : vector<1x256xf32>
      %40 = arith.mulf %29, %39 : vector<1x256xf32>
      %41 = arith.subf %27, %40 : vector<1x256xf32>
      %c0_29 = arith.constant 0 : index
      %c0_30 = arith.constant 0 : index
      %42 = vector.load %arg10[%c0_29, %c0_30] : memref<16x256xf32, #tpu.memory_space<vmem>>, vector<16x256xf32>
      %43 = vector.broadcast %39 : vector<1x256xf32> to vector<16x256xf32>
      %44 = arith.mulf %42, %43 : vector<16x256xf32>
      %45 = vector.broadcast %41 : vector<1x256xf32> to vector<16x256xf32>
      %46 = arith.addf %44, %45 : vector<16x256xf32>
      %cst_31 = arith.constant 0.000000e+00 : f32
      %47 = vector.broadcast %cst_31 : f32 to vector<16x256xf32>
      %48 = arith.maximumf %46, %47 : vector<16x256xf32>
      %49 = tpu.iota {dimensions = array<i32: 0>} : vector<16x1xi32>
      %c2_i32 = arith.constant 2 : i32
      %50 = vector.broadcast %c2_i32 : i32 to vector<16x1xi32>
      %51 = arith.cmpi slt, %49, %50 : vector<16x1xi32>
      %cst_32 = arith.constant 0.000000e+00 : f32
      %52 = vector.shape_cast %51 : vector<16x1xi1> to vector<16x1xi1>
      %53 = vector.broadcast %52 : vector<16x1xi1> to vector<16x256xi1>
      %54 = vector.broadcast %cst_32 : f32 to vector<16x256xf32>
      %55 = arith.select %53, %48, %54 : vector<16x256xi1>, vector<16x256xf32>
      %56 = arith.truncf %55 : vector<16x256xf32> to vector<16x256xbf16>
      %c0_33 = arith.constant 0 : index
      %c0_34 = arith.constant 0 : index
      %57 = vector.load %arg5[%c0_33, %c0_34] : memref<256x128xbf16, #tpu.memory_space<vmem>>, vector<256x128xbf16>
      %cst_35 = arith.constant dense<0.000000e+00> : vector<16x128xf32>
      %58 = tpu.matmul %56, %57, %cst_35 {dimension_numbers = #tpu.dot_dimension_numbers<[1], [0], [0], [1], [0, 0, 1, 1], [], []>} : vector<16x256xbf16>, vector<256x128xbf16>, vector<16x128xf32> -> vector<16x128xf32>
      %cst_36 = arith.constant dense<0.000000e+00> : vector<128xf32>
      %59 = vector.multi_reduction <add>, %58, %cst_36 [0] : vector<16x128xf32> to vector<128xf32>
      %60 = vector.shape_cast %59 : vector<128xf32> to vector<1x128xf32>
      %61 = arith.mulf %58, %58 : vector<16x128xf32>
      %cst_37 = arith.constant dense<0.000000e+00> : vector<128xf32>
      %62 = vector.multi_reduction <add>, %61, %cst_37 [0] : vector<16x128xf32> to vector<128xf32>
      %63 = vector.shape_cast %62 : vector<128xf32> to vector<1x128xf32>
      %c0_38 = arith.constant 0 : index
      %c0_39 = arith.constant 0 : index
      %64 = vector.load %arg6[%c0_38, %c0_39] : memref<1x128xf32, #tpu.memory_space<vmem>>, vector<1x128xf32>
      %c0_40 = arith.constant 0 : index
      %c0_41 = arith.constant 0 : index
      %65 = vector.load %arg7[%c0_40, %c0_41] : memref<1x128xf32, #tpu.memory_space<vmem>>, vector<1x128xf32>
      %cst_42 = arith.constant 5.000000e-01 : f32
      %66 = vector.broadcast %cst_42 : f32 to vector<1x128xf32>
      %67 = arith.mulf %60, %66 : vector<1x128xf32>
      %cst_43 = arith.constant 5.000000e-01 : f32
      %68 = vector.broadcast %cst_43 : f32 to vector<1x128xf32>
      %69 = arith.mulf %63, %68 : vector<1x128xf32>
      %70 = arith.mulf %67, %67 : vector<1x128xf32>
      %71 = arith.subf %69, %70 : vector<1x128xf32>
      %cst_44 = arith.constant 0.000000e+00 : f32
      %72 = vector.broadcast %cst_44 : f32 to vector<1x128xf32>
      %73 = arith.maximumf %71, %72 : vector<1x128xf32>
      %cst_45 = arith.constant 9.99999974E-6 : f32
      %74 = vector.broadcast %cst_45 : f32 to vector<1x128xf32>
      %75 = arith.addf %73, %74 : vector<1x128xf32>
      %76 = math.rsqrt %75 : vector<1x128xf32>
      %77 = arith.mulf %64, %76 : vector<1x128xf32>
      %78 = arith.mulf %67, %77 : vector<1x128xf32>
      %79 = arith.subf %65, %78 : vector<1x128xf32>
      %80 = vector.broadcast %77 : vector<1x128xf32> to vector<16x128xf32>
      %81 = arith.mulf %58, %80 : vector<16x128xf32>
      %82 = vector.broadcast %79 : vector<1x128xf32> to vector<16x128xf32>
      %83 = arith.addf %81, %82 : vector<16x128xf32>
      %cst_46 = arith.constant 0.000000e+00 : f32
      %84 = vector.broadcast %cst_46 : f32 to vector<16x128xf32>
      %85 = arith.maximumf %83, %84 : vector<16x128xf32>
      %86 = arith.truncf %85 : vector<16x128xf32> to vector<16x128xbf16>
      %c0_47 = arith.constant 0 : index
      %c0_48 = arith.constant 0 : index
      %87 = vector.load %arg8[%c0_47, %c0_48] : memref<128x128xbf16, #tpu.memory_space<vmem>>, vector<128x128xbf16>
      %cst_49 = arith.constant dense<0.000000e+00> : vector<16x128xf32>
      %88 = tpu.matmul %86, %87, %cst_49 {dimension_numbers = #tpu.dot_dimension_numbers<[1], [0], [0], [1], [0, 0, 1, 1], [], []>} : vector<16x128xbf16>, vector<128x128xbf16>, vector<16x128xf32> -> vector<16x128xf32>
      %c0_50 = arith.constant 0 : index
      %c0_51 = arith.constant 0 : index
      %89 = vector.load %arg9[%c0_50, %c0_51] : memref<16x128xf32, #tpu.memory_space<vmem>>, vector<16x128xf32>
      tpu.vector_store %arg9[%c0_50, %c0_51], %88 {strides = array<i32>} : memref<16x128xf32, #tpu.memory_space<vmem>>, vector<16x128xf32>,
    } else {
    }
    return
  }
  func.func @transform_0(%arg0: i32) -> (i32, i32) {
    %c0_i32 = arith.constant 0 : i32
    %c0_i32_0 = arith.constant 0 : i32
    return %arg0, %c0_i32 : i32, i32
  }
  func.func @transform_1(%arg0: i32) -> (i32, i32) {
    %c0_i32 = arith.constant 0 : i32
    %c0_i32_0 = arith.constant 0 : i32
    %c0_i32_1 = arith.constant 0 : i32
    return %c0_i32, %c0_i32_0 : i32, i32
  }
  func.func @transform_2(%arg0: i32) -> (i32, i32) {
    %c0_i32 = arith.constant 0 : i32
    %c0_i32_0 = arith.constant 0 : i32
    %c0_i32_1 = arith.constant 0 : i32
    return %c0_i32, %c0_i32_0 : i32, i32
  }
  func.func @transform_3(%arg0: i32) -> (i32, i32) {
    %c0_i32 = arith.constant 0 : i32
    %c0_i32_0 = arith.constant 0 : i32
    %c0_i32_1 = arith.constant 0 : i32
    return %c0_i32, %c0_i32_0 : i32, i32
  }
  func.func @transform_4(%arg0: i32) -> (i32, i32) {
    %c0_i32 = arith.constant 0 : i32
    %c0_i32_0 = arith.constant 0 : i32
    %c0_i32_1 = arith.constant 0 : i32
    return %c0_i32, %c0_i32_0 : i32, i32
  }
  func.func @transform_5(%arg0: i32) -> (i32, i32) {
    %c0_i32 = arith.constant 0 : i32
    %c0_i32_0 = arith.constant 0 : i32
    %c0_i32_1 = arith.constant 0 : i32
    return %c0_i32, %c0_i32_0 : i32, i32
  }
  func.func @transform_6(%arg0: i32) -> (i32, i32) {
    %c0_i32 = arith.constant 0 : i32
    %c0_i32_0 = arith.constant 0 : i32
    %c0_i32_1 = arith.constant 0 : i32
    return %c0_i32, %c0_i32_0 : i32, i32
  }
  func.func @transform_7(%arg0: i32) -> (i32, i32) {
    %c0_i32 = arith.constant 0 : i32
    %c0_i32_0 = arith.constant 0 : i32
    %c0_i32_1 = arith.constant 0 : i32
    return %c0_i32, %c0_i32_0 : i32, i32
  }
  func.func @transform_8(%arg0: i32) -> (i32, i32) {
    %c0_i32 = arith.constant 0 : i32
    %c0_i32_0 = arith.constant 0 : i32
    %c0_i32_1 = arith.constant 0 : i32
    return %c0_i32, %c0_i32_0 : i32, i32
  }
}

</mosaic_0001>

<bundles_post_ra>
// kernel: ts_net_forward.1
= control target key start
LH: loop header
LB: loop body
LE: loop exit
PB: predicated region body
PF: predicated region fallthrough
CT: control target
= control target key end

     0   :  { %vm1310_vm2 = vmmov 1   ;;  %vm1311_vm4 = vmmov 0   ;;  %s1696_s1 = inlined_call_operand.vmem [shape: bf16[512,256], index: 1, kind: input, shape index: {}]   ;;  %s1697_s0 = inlined_call_operand.vmem [shape: bf16[16,512], index: 0, kind: input, shape index: {}]   ;;  %s1698_s4 = inlined_call_operand.vmem [shape: bf16[256,128], index: 4, kind: input, shape index: {}]   ;;  %s1699_s2 = inlined_call_operand.vmem [shape: f32[1,256], index: 2, kind: input, shape index: {}]   ;;  %s1700_s3 = inlined_call_operand.vmem [shape: f32[1,256], index: 3, kind: input, shape index: {}]   ;;  %s1701_s7 = inlined_call_operand.vmem [shape: bf16[128,128], index: 7, kind: input, shape index: {}]   ;;  %s1702_s5 = inlined_call_operand.vmem [shape: f32[1,128], index: 5, kind: input, shape index: {}]   ;;  %s1703_s6 = inlined_call_operand.vmem [shape: f32[1,128], index: 6, kind: input, shape index: {}]   ;;  %s1704_s8 = inlined_call_operand.vmem [shape: f32[16,128], index: 8, kind: output, shape index: {}]  }
   0x1   :  { %v1178_v0 = vld [vmem:[%s1696_s1 + $0x4] ss:$8 sps:$4 sm:$0xff]   ;;  %v1180_v1 = vld [vmem:[%s1696_s1] ss:$8 sps:$4 sm:$0xff]   ;;  %v1181_v2 = vld [vmem:[%s1696_s1 + $0x14] ss:$8 sps:$4 sm:$0xff]  }
   0x2   :  { %448 = vmatprep.subr.bf16.mxu0 %v1178_v0  ;;  %v1183_v3 = vld [vmem:[%s1696_s1 + $0x10] ss:$8 sps:$4 sm:$0xff]   ;;  %v1184_v4 = vld [vmem:[%s1696_s1 + $0x24] ss:$8 sps:$4 sm:$0xff]   ;;  %v1186_v5 = vld [vmem:[%s1696_s1 + $0x20] ss:$8 sps:$4 sm:$0xff]  }
   0x3   :  { %449 = vmatpush1.bf16.msra.mxu0 %v1180_v1  ;;  %v1187_v6 = vld [vmem:[%s1696_s1 + $0x34] ss:$8 sps:$4 sm:$0xff]   ;;  %v1189_v7 = vld [vmem:[%s1696_s1 + $0x30] ss:$8 sps:$4 sm:$0xff]   ;;  %v1190_v8 = vld [vmem:[%s1696_s1 + $0x44] ss:$8 sps:$4 sm:$0xff]  }
   0x4   :  { %450 = vmatprep.subr.bf16.mxu0 %v1181_v2  ;;  %v1192_v9 = vld [vmem:[%s1696_s1 + $0x40] ss:$8 sps:$4 sm:$0xff]   ;;  %v1193_v10 = vld [vmem:[%s1696_s1 + $0x54] ss:$8 sps:$4 sm:$0xff]   ;;  %v1195_v11 = vld [vmem:[%s1696_s1 + $0x50] ss:$8 sps:$4 sm:$0xff]  }
   0x5   :  { %v1196_v12 = vld [vmem:[%s1696_s1 + $0x64] ss:$8 sps:$4 sm:$0xff]   ;;  %v1198_v14 = vld [vmem:[%s1696_s1 + $0x60] ss:$8 sps:$4 sm:$0xff]   ;;  %v1199_v15 = vld [vmem:[%s1696_s1 + $0x74] ss:$8 sps:$4 sm:$0xff]  }
   0x6   :  { %v1228_v13 = vld [vmem:[%s1697_s0 + $0x4] ss:$16 sps:$4 sm:$0xff]   ;;  %v1201_v16 = vld [vmem:[%s1696_s1 + $0x70] ss:$8 sps:$4 sm:$0xff]   ;;  %v1204_v18 = vld [vmem:[%s1696_s1 + $0x80] ss:$8 sps:$4 sm:$0xff]  }
   0x7   :  { %451 = vmatpush1.bf16.msra.mxu0 %v1183_v3  ;;  %480 = vmatprep.mubr.bf16.mxu0 %v1228_v13  ;;  %v1202_v17 = vld [vmem:[%s1696_s1 + $0x84] ss:$8 sps:$4 sm:$0xff]   ;;  %v1205_v19 = vld [vmem:[%s1696_s1 + $0x94] ss:$8 sps:$4 sm:$0xff]   ;;  %v1207_v20 = vld [vmem:[%s1696_s1 + $0x90] ss:$8 sps:$4 sm:$0xff]  }
   0x8   :  { %452 = vmatprep.subr.bf16.mxu0 %v1184_v4  ;;  %v1208_v21 = vld [vmem:[%s1696_s1 + $0xa4] ss:$8 sps:$4 sm:$0xff]   ;;  %v1210_v22 = vld [vmem:[%s1696_s1 + $0xa0] ss:$8 sps:$4 sm:$0xff]   ;;  %v1211_v23 = vld [vmem:[%s1696_s1 + $0xb4] ss:$8 sps:$4 sm:$0xff]   ;;  %v34_v4 = vlaneseq }
   0x9   :  { %v1213_v24 = vld [vmem:[%s1696_s1 + $0xb0] ss:$8 sps:$4 sm:$0xff]   ;;  %v1214_v25 = vld [vmem:[%s1696_s1 + $0xc4] ss:$8 sps:$4 sm:$0xff]   ;;  %v1216_v26 = vld [vmem:[%s1696_s1 + $0xc0] ss:$8 sps:$4 sm:$0xff]  }
   0xa   :  { %v1217_v27 = vld [vmem:[%s1696_s1 + $0xd4] ss:$8 sps:$4 sm:$0xff]   ;;  %v1219_v28 = vld [vmem:[%s1696_s1 + $0xd0] ss:$8 sps:$4 sm:$0xff]   ;;  %v1220_v29 = vld [vmem:[%s1696_s1 + $0xe4] ss:$8 sps:$4 sm:$0xff]  }
   0xb   :  { %453 = vmatpush1.bf16.msra.mxu0 %v1186_v5  ;;  %v1222_v30 = vld [vmem:[%s1696_s1 + $0xe0] ss:$8 sps:$4 sm:$0xff]   ;;  %v1223_v31 = vld [vmem:[%s1696_s1 + $0xf4] ss:$8 sps:$4 sm:$0xff]   ;;  %v1225_v32 = vld [vmem:[%s1696_s1 + $0xf0] ss:$8 sps:$4 sm:$0xff]  }
   0xc   :  { %454 = vmatprep.subr.bf16.mxu0 %v1187_v6  ;;  %v1231_v33 = vld [vmem:[%s1696_s1 + $0x104] ss:$8 sps:$4 sm:$0xff]   ;;  %v1226_v34 = vld [vmem:[%s1697_s0] ss:$16 sps:$4 sm:$0xff]   ;;  %v1234_v37 = vld [vmem:[%s1696_s1 + $0x114] ss:$8 sps:$4 sm:$0xff]  }
   0xd   :  { %v1229_v35 = vld [vmem:[%s1696_s1 + $0x100] ss:$8 sps:$4 sm:$0xff]   ;;  %v1279_v36 = vld [vmem:[%s1697_s0 + $0xc] ss:$16 sps:$4 sm:$0xff]   ;;  %v1232_v38 = vld [vmem:[%s1696_s1 + $0x110] ss:$8 sps:$4 sm:$0xff]  }
   0xe   :  { %v1237_v39 = vld [vmem:[%s1696_s1 + $0x124] ss:$8 sps:$4 sm:$0xff]   ;;  %v1235_v40 = vld [vmem:[%s1696_s1 + $0x120] ss:$8 sps:$4 sm:$0xff]   ;;  %v1240_v41 = vld [vmem:[%s1696_s1 + $0x134] ss:$8 sps:$4 sm:$0xff]  }
   0xf   :  { %455 = vmatpush1.bf16.msra.mxu0 %v1189_v7  ;;  %v1238_v42 = vld [vmem:[%s1696_s1 + $0x130] ss:$8 sps:$4 sm:$0xff]   ;;  %v1243_v43 = vld [vmem:[%s1696_s1 + $0x144] ss:$8 sps:$4 sm:$0xff]   ;;  %v1241_v44 = vld [vmem:[%s1696_s1 + $0x140] ss:$8 sps:$4 sm:$0xff]  }
  0x10   :  { %456 = vmatprep.subr.bf16.mxu0 %v1190_v8  ;;  %v1246_v45 = vld [vmem:[%s1696_s1 + $0x154] ss:$8 sps:$4 sm:$0xff]   ;;  %v1244_v46 = vld [vmem:[%s1696_s1 + $0x150] ss:$8 sps:$4 sm:$0xff]   ;;  %v1249_v47 = vld [vmem:[%s1696_s1 + $0x164] ss:$8 sps:$4 sm:$0xff]  }
  0x11   :  { %v1247_v48 = vld [vmem:[%s1696_s1 + $0x160] ss:$8 sps:$4 sm:$0xff]   ;;  %v1252_v49 = vld [vmem:[%s1696_s1 + $0x174] ss:$8 sps:$4 sm:$0xff]   ;;  %v1250_v50 = vld [vmem:[%s1696_s1 + $0x170] ss:$8 sps:$4 sm:$0xff]  }
  0x12   :  { %v1255_v51 = vld [vmem:[%s1696_s1 + $0x184] ss:$8 sps:$4 sm:$0xff]   ;;  %v1253_v52 = vld [vmem:[%s1696_s1 + $0x180] ss:$8 sps:$4 sm:$0xff]   ;;  %v1258_v53 = vld [vmem:[%s1696_s1 + $0x194] ss:$8 sps:$4 sm:$0xff]  }
  0x13   :  { %457 = vmatpush1.bf16.msra.mxu0 %v1192_v9  ;;  %v1256_v54 = vld [vmem:[%s1696_s1 + $0x190] ss:$8 sps:$4 sm:$0xff]   ;;  %v1261_v55 = vld [vmem:[%s1696_s1 + $0x1a4] ss:$8 sps:$4 sm:$0xff]   ;;  %v1259_v56 = vld [vmem:[%s1696_s1 + $0x1a0] ss:$8 sps:$4 sm:$0xff]  }
  0x14   :  { %458 = vmatprep.subr.bf16.mxu0 %v1193_v10  ;;  %v1264_v57 = vld [vmem:[%s1696_s1 + $0x1b4] ss:$8 sps:$4 sm:$0xff]   ;;  %v1262_v58 = vld [vmem:[%s1696_s1 + $0x1b0] ss:$8 sps:$4 sm:$0xff]   ;;  %v1267_v59 = vld [vmem:[%s1696_s1 + $0x1c4] ss:$8 sps:$4 sm:$0xff]  }
  0x15   :  { %v1265_v60 = vld [vmem:[%s1696_s1 + $0x1c0] ss:$8 sps:$4 sm:$0xff]   ;;  %v1270_v61 = vld [vmem:[%s1696_s1 + $0x1d4] ss:$8 sps:$4 sm:$0xff]   ;;  %v1268_v62 = vld [vmem:[%s1696_s1 + $0x1d0] ss:$8 sps:$4 sm:$0xff]  }
  0x16   :  { %v1273_v63 = vld [vmem:[%s1696_s1 + $0x1e4] ss:$8 sps:$4 sm:$0xff]   ;;  %v1271_v0 = vld [vmem:[%s1696_s1 + $0x1e0] ss:$8 sps:$4 sm:$0xff]   ;;  %v1276_v1 = vld [vmem:[%s1696_s1 + $0x1f4] ss:$8 sps:$4 sm:$0xff]  }
  0x17   :  { %459 = vmatpush1.bf16.msra.mxu0 %v1195_v11  ;;  %v1274_v2 = vld [vmem:[%s1696_s1 + $0x1f0] ss:$8 sps:$4 sm:$0xff]   ;;  %vm1562_vm0 = vcmp.lt.s32.totalorder %v34_v4, 256  ;;  %v1308_v6 = vmov 0.0   ;;  %v1280_v7 = vld [vmem:[%s1698_s4 + $0x40] sm:$0xff]   ;;  %v1282_v9 = vld [vmem:[%s1698_s4 + $0x48] sm:$0xff]  }
  0x18   :  { %460 = vmatprep.subr.bf16.mxu0 %v1196_v12  ;;  %v1277_v3 = vld [vmem:[%s1697_s0 + $0x8] ss:$16 sps:$4 sm:$0xff]   ;;  %38 = vst.msk [vmem:[#allocation3] sm:$0x3] %vm1562_vm0, %v1308_v6  ;;  %39 = vst.msk [vmem:[#allocation4] sm:$0x3] %vm1562_vm0, %v1308_v6  ;;  %1119 = vmatprep.subr.bf16.mxu1 %v1280_v7 }
  0x19   :  { %v1281_v8 = vld [vmem:[%s1698_s4] sm:$0xff]   ;;  %v1283_v10 = vld [vmem:[%s1698_s4 + $0x8] sm:$0xff]   ;;  %v1284_v11 = vld [vmem:[%s1698_s4 + $0x50] sm:$0xff]  }
  0x1a   :  { %1120 = vmatpush3.bf16.msra.mxu1 %v1281_v8  ;;  %v1285_v12 = vld [vmem:[%s1698_s4 + $0x10] sm:$0xff]   ;;  %v1286_v13 = vld [vmem:[%s1698_s4 + $0x58] sm:$0xff]   ;;  %v628_v5 = vld [vmem:[%s1700_s3] sm:$0x3] }
  0x1b   :  { %461 = vmatpush1.bf16.msra.mxu0 %v1198_v14  ;;  %1121 = vmatprep.subr.bf16.mxu1 %v1282_v9  ;;  %v1287_v14 = vld [vmem:[%s1698_s4 + $0x18] sm:$0xff]  }
  0x1c   :  { %462 = vmatprep.subr.bf16.mxu0 %v1199_v15  ;;  %v1288_v15 = vld [vmem:[%s1698_s4 + $0x60] sm:$0xff]  }
  0x1e   :  { %1122 = vmatpush3.bf16.msra.mxu1 %v1283_v10 }
  0x1f   :  { %463 = vmatpush1.bf16.msra.mxu0 %v1201_v16  ;;  %1123 = vmatprep.subr.bf16.mxu1 %v1284_v11  ;;  %v1289_v16 = vld [vmem:[%s1698_s4 + $0x20] sm:$0xff]  }
  0x20   :  { %464 = vmatprep.subr.bf16.mxu0 %v1202_v17  ;;  %v1290_v17 = vld [vmem:[%s1698_s4 + $0x68] sm:$0xff]   ;;  %v583_v9 = vld [vmem:[#allocation4] sm:$0x3] }
  0x22   :  { %1124 = vmatpush3.bf16.msra.mxu1 %v1285_v12 }
  0x23   :  { %465 = vmatpush1.bf16.msra.mxu0 %v1204_v18  ;;  %1125 = vmatprep.subr.bf16.mxu1 %v1286_v13  ;;  %v1291_v18 = vld [vmem:[%s1698_s4 + $0x28] sm:$0xff]  }
  0x24   :  { %466 = vmatprep.subr.bf16.mxu0 %v1205_v19  ;;  %v1292_v19 = vld [vmem:[%s1698_s4 + $0x70] sm:$0xff]  }
  0x26   :  { %1126 = vmatpush3.bf16.msra.mxu1 %v1287_v14 }
  0x27   :  { %467 = vmatpush1.bf16.msra.mxu0 %v1207_v20  ;;  %1127 = vmatprep.subr.bf16.mxu1 %v1288_v15  ;;  %v1293_v20 = vld [vmem:[%s1698_s4 + $0x30] sm:$0xff]  }
  0x28   :  { %468 = vmatprep.subr.bf16.mxu0 %v1208_v21  ;;  %v1294_v21 = vld [vmem:[%s1698_s4 + $0x78] sm:$0xff]  }
  0x2a   :  { %1128 = vmatpush3.bf16.msra.mxu1 %v1289_v16 }
  0x2b   :  { %469 = vmatpush1.bf16.msra.mxu0 %v1210_v22  ;;  %1129 = vmatprep.subr.bf16.mxu1 %v1290_v17  ;;  %v1295_v22 = vld [vmem:[%s1698_s4 + $0x38] sm:$0xff]  }
  0x2c   :  { %470 = vmatprep.subr.bf16.mxu0 %v1211_v23 }
  0x2e   :  { %1130 = vmatpush3.bf16.msra.mxu1 %v1291_v18 }
  0x2f   :  { %471 = vmatpush1.bf16.msra.mxu0 %v1213_v24  ;;  %1131 = vmatprep.subr.bf16.mxu1 %v1292_v19 }
  0x30   :  { %472 = vmatprep.subr.bf16.mxu0 %v1214_v25 }
  0x32   :  { %1132 = vmatpush3.bf16.msra.mxu1 %v1293_v20  ;;  %v627_v20 = vld [vmem:[%s1699_s2] sm:$0x3] }
  0x33   :  { %473 = vmatpush1.bf16.msra.mxu0 %v1216_v26  ;;  %1133 = vmatprep.subr.bf16.mxu1 %v1294_v21 }
  0x34   :  { %474 = vmatprep.subr.bf16.mxu0 %v1217_v27 }
  0x36   :  { %1134 = vmatpush3.bf16.msra.mxu1 %v1295_v22 }
  0x37   :  { %475 = vmatpush1.bf16.msra.mxu0 %v1219_v28  ;;  %1150 = vmatprep.subr.bf16.mxu1 %v1308_v6 }
  0x38   :  { %476 = vmatprep.subr.bf16.mxu0 %v1220_v29 }
  0x3b   :  { %477 = vmatpush1.bf16.msra.mxu0 %v1222_v30 }
  0x3c   :  { %478 = vmatprep.subr.bf16.mxu0 %v1223_v31 }
  0x3f   :  { %479 = vmatpush1.bf16.msra.mxu0 %v1225_v32 }
  0x40   :  { %491 = vmatprep.subr.bf16.mxu0 %v1231_v33 }
  0x42   :  { %481 = vmatmul.mubr.bf16.vlgmr.msra.gmra.mrb[0].mxu0 %v1226_v34 }
  0x43   :  { %492 = vmatpush1.bf16.msra.mxu0 %v1229_v35  ;;  %523 = vmatprep.mubr.bf16.mxu0 %v1279_v36 }
  0x44   :  { %493 = vmatprep.subr.bf16.mxu0 %v1234_v37 }
  0x47   :  { %494 = vmatpush1.bf16.msra.mxu0 %v1232_v38 }
  0x48   :  { %495 = vmatprep.subr.bf16.mxu0 %v1237_v39 }
  0x4b   :  { %496 = vmatpush1.bf16.msra.mxu0 %v1235_v40 }
  0x4c   :  { %497 = vmatprep.subr.bf16.mxu0 %v1240_v41  ;;  %v1309_v41 = vmov 1966171168  }
  0x4f   :  { %498 = vmatpush1.bf16.msra.mxu0 %v1238_v42  ;;  %v563_v42 = vunpack.c.l.s4 %v1309_v41  ;;  %v1298_v41 = vld [vmem:[%s1701_s7 + $0x10] sm:$0xff]  }
  0x50   :  { %499 = vmatprep.subr.bf16.mxu0 %v1243_v43 }
  0x53   :  { %500 = vmatpush1.bf16.msra.mxu0 %v1241_v44 }
  0x54   :  { %501 = vmatprep.subr.bf16.mxu0 %v1246_v45 }
  0x57   :  { %502 = vmatpush1.bf16.msra.mxu0 %v1244_v46 }
  0x58   :  { %503 = vmatprep.subr.bf16.mxu0 %v1249_v47 }
  0x5b   :  { %504 = vmatpush1.bf16.msra.mxu0 %v1247_v48 }
  0x5c   :  { %505 = vmatprep.subr.bf16.mxu0 %v1252_v49 }
  0x5f   :  { %506 = vmatpush1.bf16.msra.mxu0 %v1250_v50 }
  0x60   :  { %507 = vmatprep.subr.bf16.mxu0 %v1255_v51  ;;  %v564_v51 = vunpack.c.0.s8 %v563_v42  ;;  %v1299_v42 = vld [vmem:[%s1701_s7 + $0x18] sm:$0xff]  }
  0x63   :  { %508 = vmatpush1.bf16.msra.mxu0 %v1253_v52  ;;  %v566_v52 = vshrl.u32 %v34_v4, 7 }
  0x64   :  { %509 = vmatprep.subr.bf16.mxu0 %v1258_v53 }
  0x65   :  { %v1639_v21 = vsub.s32 0, %v566_v52  ;;  %v650_v22 = vsub.s32 1, %v566_v52  ;;  %vm680_vm1 = vcmp.lt.s32.totalorder %v566_v52, 2 }
  0x66   :  { %vm1105_vm3 = vmpackc.low %vm1310_vm2, %vm680_vm1 }
  0x67   :  { %510 = vmatpush1.bf16.msra.mxu0 %v1256_v54 }
  0x68   :  { %511 = vmatprep.subr.bf16.mxu0 %v1261_v55 }
  0x6b   :  { %512 = vmatpush1.bf16.msra.mxu0 %v1259_v56 }
  0x6c   :  { %513 = vmatprep.subr.bf16.mxu0 %v1264_v57 }
  0x6f   :  { %514 = vmatpush1.bf16.msra.mxu0 %v1262_v58 }
  0x70   :  { %515 = vmatprep.subr.bf16.mxu0 %v1267_v59 }
  0x73   :  { %516 = vmatpush1.bf16.msra.mxu0 %v1265_v60 }
  0x74   :  { %517 = vmatprep.subr.bf16.mxu0 %v1270_v61  ;;  %v567_v61 = vsub.s32 %v564_v51, %v566_v52 }
  0x77   :  { %518 = vmatpush1.bf16.msra.mxu0 %v1268_v62 }
  0x78   :  { %519 = vmatprep.subr.bf16.mxu0 %v1273_v63 }
  0x7b   :  { %520 = vmatpush1.bf16.msra.mxu0 %v1271_v0 }
  0x7c   :  { %521 = vmatprep.subr.bf16.mxu0 %v1276_v1 }
  0x7f   :  { %522 = vmatpush1.bf16.msra.mxu0 %v1274_v2 }
  0x82   :  { %524 = vmatmul.mubr.bf16.vlgmr.msra.gmra.mrb[0].mxu0 %v1277_v3  ;;  %v544_v3 = vld [vmem:[#allocation3] sm:$0x3] }
 0x155   :  { %v1621_v23 = vpop.f32.mrb[0].mxu0 }
 0x156   :  { %v1623_v24 = vpop.f32.mrb[1].mxu0  ;;  %v584_v26 = vmul.f32 %v1621_v23, %v1621_v23 }
 0x157   :  { %v529_v25 = vpop.f32.mrb[2].mxu0  ;;  %v585_v30 = vmul.f32 %v1623_v24, %v1623_v24 }
 0x158   :  { %v545_v27 = vadd.f32 %v529_v25, %v1621_v23  ;;  %v586_v28 = vmul.f32 %v529_v25, %v529_v25  ;;  %v531_v29 = vpop.f32.mrb[3].mxu0 }
 0x159   :  { %v552_v31 = vadd.f32 %v531_v29, %v1623_v24  ;;  %v587_v32 = vmul.f32 %v531_v29, %v531_v29 }
 0x15a   :  { %v546_v33 = vrot.slane %v545_v27, 4  ;;  %v588_v34 = vadd.f32 %v586_v28, %v584_v26 }
 0x15b   :  { %v553_v35 = vrot.slane %v552_v31, 4  ;;  %v595_v36 = vadd.f32 %v587_v32, %v585_v30 }
 0x15c   :  { %v547_v37 = vadd.f32 %v546_v33, %v545_v27  ;;  %v589_v38 = vrot.slane %v588_v34, 4 }
 0x15d   :  { %v554_v39 = vadd.f32 %v553_v35, %v552_v31  ;;  %v596_v40 = vrot.slane %v595_v36, 4 }
 0x15e   :  { %v548_v43 = vrot.slane %v547_v37, 2  ;;  %v590_v44 = vadd.f32 %v589_v38, %v588_v34 }
 0x15f   :  { %v555_v45 = vrot.slane %v554_v39, 2  ;;  %v597_v46 = vadd.f32 %v596_v40, %v595_v36 }
 0x160   :  { %v549_v47 = vadd.f32 %v548_v43, %v547_v37  ;;  %v591_v48 = vrot.slane %v590_v44, 2  ;;  %v1300_v43 = vld [vmem:[%s1701_s7 + $0x20] sm:$0xff]  }
 0x161   :  { %v556_v49 = vadd.f32 %v555_v45, %v554_v39  ;;  %v598_v50 = vrot.slane %v597_v46, 2  ;;  %v1302_v45 = vld [vmem:[%s1701_s7 + $0x30] sm:$0xff]  }
 0x162   :  { %v550_v53 = vrot.slane %v549_v47, 1  ;;  %v592_v54 = vadd.f32 %v591_v48, %v590_v44  ;;  %v1301_v44 = vld [vmem:[%s1701_s7 + $0x28] sm:$0xff]  }
 0x163   :  { %v557_v55 = vrot.slane %v556_v49, 1  ;;  %v599_v56 = vadd.f32 %v598_v50, %v597_v46  ;;  %v1303_v46 = vld [vmem:[%s1701_s7 + $0x38] sm:$0xff]  }
 0x164   :  { %v551_v57 = vadd.f32 %v550_v53, %v549_v47  ;;  %v593_v58 = vrot.slane %v592_v54, 1 }
 0x165   :  { %v558_v59 = vadd.f32 %v557_v55, %v556_v49  ;;  %v600_v60 = vrot.slane %v599_v56, 1 }
 0x166   :  { %v594_v62 = vadd.f32 %v593_v58, %v592_v54 }
 0x167   :  { %v561_v63 = vcombine.low %v551_v57, %v558_v59  ;;  %v601_v0 = vadd.f32 %v600_v60, %v599_v56 }
 0x169   :  { %v604_v1 = vcombine.low %v594_v62, %v601_v0  ;;  %v568_v2 = vrot.slane %v561_v63, %v567_v61 }
 0x16b   :  { %v575_v7 = vrot.slane %v568_v2, %v567_v61  ;;  %v611_v8 = vrot.slane %v604_v1, %v567_v61 }
 0x16d   :  { %v577_v10 = vadd.f32 %v575_v7, %v544_v3  ;;  %v618_v4 = vrot.slane %v611_v8, %v567_v61 }
 0x16f   :  { %582 = vst.msk [vmem:[#allocation3] sm:$0x3] %vm1562_vm0, %v577_v10  ;;  %v620_v11 = vadd.f32 %v618_v4, %v583_v9 }
 0x171   :  { %621 = vst.msk [vmem:[#allocation4] sm:$0x3] %vm1562_vm0, %v620_v11 }
 0x176   :  { %v625_v12 = vld [vmem:[#allocation3] sm:$0x3] }
 0x177   :  { %v629_v13 = vmul.f32 0.5, %v625_v12  ;;  %v877_v12 = vld [vmem:[%s1702_s5] sm:$0x1] }
 0x178   :  { %v626_v14 = vld [vmem:[#allocation4] sm:$0x3] }
 0x179   :  { %v630_v15 = vmul.f32 0.5, %v626_v14  ;;  %v631_v16 = vmul.f32 %v629_v13, %v629_v13 }
 0x17b   :  { %v632_v17 = vsub.f32 %v630_v15, %v631_v16  ;;  %v878_v15 = vld [vmem:[%s1703_s6] sm:$0x1] }
 0x17d   :  { %v633_v18 = vmax.f32 %v632_v17, 0.0 }
 0x17f   :  { %v634_v19 = vadd.f32 1e-05, %v633_v18 }
 0x181   :  { %1304 = vrsqrt.f32 %v634_v19 }
 0x18b   :  { %v1305_v25 = vpop.eup %1304 }
 0x18c   :  { %v636_v26 = vmul.f32 %v1305_v25, %v627_v20 }
 0x18e   :  { %v637_v27 = vmul.f32 %v636_v26, %v629_v13  ;;  %v651_v28 = vrot.slane %v636_v26, %v650_v22  ;;  %v647_v29 = vrot.slane %v636_v26, %v1639_v21 }
 0x190   :  { %v638_v30 = vsub.f32 %v628_v5, %v637_v27  ;;  %v655_v31 = vmul.f32 %v651_v28, %v1623_v24  ;;  %v654_v34 = vmul.f32 %v647_v29, %v1621_v23  ;;  %v1296_v24 = vld [vmem:[%s1701_s7] sm:$0xff]   ;;  %v1297_v23 = vld [vmem:[%s1701_s7 + $0x8] sm:$0xff]  }
 0x192   :  { %v662_v32 = vrot.slane %v638_v30, %v1639_v21  ;;  %v666_v33 = vrot.slane %v638_v30, %v650_v22 }
 0x194   :  { %v670_v35 = vadd.f32 %v666_v33, %v655_v31  ;;  %v669_v36 = vadd.f32 %v662_v32, %v654_v34 }
 0x196   :  { %v674_v37 = vmax.f32 %v670_v35, 0.0  ;;  %v673_v38 = vmax.f32 %v669_v36, 0.0 }
 0x198   :  { %v1106_v39 = vpack.c.bf16 %v1308_v6, %v674_v37  ;;  %v1109_v40 = vpack.c.bf16 %v1308_v6, %v673_v38 }
 0x19a   :  { %1107 = vmatprep.mubr.msk.bf16.mxu1 %vm1105_vm3, %v1106_v39 }
 0x19b   :  { %1110 = vmatmul.mubr.msk.bf16.vlgmr.msra.gmra.mrb[0].mxu1 %vm1105_vm3, %v1109_v40 }
 0x19c   :  { %1151 = vmatpush3.bf16.msra.mxu1 %v1296_v24  ;;  %1166 = vmatprep.mubr.msk.bf16.mxu1 %vm1311_vm4, %v1308_v6 }
 0x19d   :  { %1152 = vmatprep.subr.bf16.mxu1 %v1308_v6 }
 0x1a0   :  { %1153 = vmatpush3.bf16.msra.mxu1 %v1297_v23 }
 0x1a1   :  { %1154 = vmatprep.subr.bf16.mxu1 %v1308_v6 }
 0x1a4   :  { %1155 = vmatpush3.bf16.msra.mxu1 %v1298_v41 }
 0x1a5   :  { %1156 = vmatprep.subr.bf16.mxu1 %v1308_v6 }
 0x1a8   :  { %1157 = vmatpush3.bf16.msra.mxu1 %v1299_v42 }
 0x1a9   :  { %1158 = vmatprep.subr.bf16.mxu1 %v1308_v6 }
 0x1ac   :  { %1159 = vmatpush3.bf16.msra.mxu1 %v1300_v43 }
 0x1ad   :  { %1160 = vmatprep.subr.bf16.mxu1 %v1308_v6 }
 0x1b0   :  { %1161 = vmatpush3.bf16.msra.mxu1 %v1301_v44 }
 0x1b1   :  { %1162 = vmatprep.subr.bf16.mxu1 %v1308_v6 }
 0x1b4   :  { %1163 = vmatpush3.bf16.msra.mxu1 %v1302_v45 }
 0x1b5   :  { %1164 = vmatprep.subr.bf16.mxu1 %v1308_v6 }
 0x1b8   :  { %1165 = vmatpush3.bf16.msra.mxu1 %v1303_v46 }
 0x26e   :  { %v1135_v47 = vpop.f32.mrb[0].mxu1 }
 0x26f   :  { %v1136_v48 = vpop.f32.mrb[1].mxu1 }
 0x270   :  { %v1137_v49 = vadd.f32 %v1136_v48, %v1135_v47  ;;  %v1138_v50 = vpop.f32.mrb[2].mxu1 }
 0x271   :  { %v1139_v51 = vpop.f32.mrb[3].mxu1 }
 0x272   :  { %v1140_v52 = vadd.f32 %v1139_v51, %v1138_v50  ;;  %v868_v53 = vmul.f32 %v1137_v49, %v1137_v49 }
 0x274   :  { %v861_v54 = vadd.f32 %v1140_v52, %v1137_v49  ;;  %v869_v55 = vmul.f32 %v1140_v52, %v1140_v52 }
 0x276   :  { %v862_v56 = vrot.slane %v861_v54, 4  ;;  %v870_v57 = vadd.f32 %v869_v55, %v868_v53 }
 0x278   :  { %v863_v58 = vadd.f32 %v862_v56, %v861_v54  ;;  %v871_v59 = vrot.slane %v870_v57, 4 }
 0x27a   :  { %v864_v60 = vrot.slane %v863_v58, 2  ;;  %v872_v61 = vadd.f32 %v871_v59, %v870_v57 }
 0x27c   :  { %v865_v62 = vadd.f32 %v864_v60, %v863_v58  ;;  %v873_v63 = vrot.slane %v872_v61, 2 }
 0x27e   :  { %v866_v0 = vrot.slane %v865_v62, 1  ;;  %v874_v1 = vadd.f32 %v873_v63, %v872_v61 }
 0x280   :  { %v867_v6 = vadd.f32 %v866_v0, %v865_v62  ;;  %v875_v2 = vrot.slane %v874_v1, 1 }
 0x282   :  { %v876_v3 = vadd.f32 %v875_v2, %v874_v1  ;;  %v879_v7 = vmul.f32 0.5, %v867_v6 }
 0x284   :  { %v880_v8 = vmul.f32 0.5, %v876_v3  ;;  %v881_v9 = vmul.f32 %v879_v7, %v879_v7 }
 0x286   :  { %v882_v10 = vsub.f32 %v880_v8, %v881_v9 }
 0x288   :  { %v883_v4 = vmax.f32 %v882_v10, 0.0 }
 0x28a   :  { %v884_v11 = vadd.f32 1e-05, %v883_v4 }
 0x28c   :  { %1306 = vrsqrt.f32 %v884_v11 }
 0x296   :  { %v1307_v13 = vpop.eup %1306 }
 0x297   :  { %v886_v14 = vmul.f32 %v1307_v13, %v877_v12 }
 0x299   :  { %v887_v16 = vmul.f32 %v886_v14, %v879_v7  ;;  %v893_v17 = vrot.slane %v886_v14, %v1639_v21 }
 0x29b   :  { %v888_v18 = vsub.f32 %v878_v15, %v887_v16  ;;  %v895_v19 = vmul.f32 %v1137_v49, %v893_v17  ;;  %v896_v20 = vmul.f32 %v1140_v52, %v893_v17 }
 0x29d   :  { %v901_v22 = vrot.slane %v888_v18, %v1639_v21 }
 0x29f   :  { %v904_v25 = vadd.f32 %v901_v22, %v896_v20  ;;  %v903_v26 = vadd.f32 %v901_v22, %v895_v19 }
 0x2a1   :  { %v906_v5 = vmax.f32 %v904_v25, 0.0  ;;  %v905_v27 = vmax.f32 %v903_v26, 0.0 }
 0x2a3   :  { %v907_v28 = vpack.c.bf16 %v906_v5, %v905_v27 }
 0x2a5   :  { %1167 = vmatmul.mubr.bf16.vlgmr.msra.gmra.mrb[4].mxu1 %v907_v28 }
 0x378   :  { %v1006_v29 = vpop.f32.mrb[4].mxu1 }
 0x379   :  { %1013 = vst [vmem:[%s1704_s8] sm:$0xff] %v1006_v29  ;;  %v1168_v30 = vpop.f32.mrb[5].mxu1 }
 0x37a   :  { %v1009_v31 = vpop.f32.mrb[6].mxu1 }
 0x37b   :  { %1014 = vst [vmem:[%s1704_s8 + $0x8] sm:$0xff] %v1009_v31  ;;  %v1169_v32 = vpop.f32.mrb[7].mxu1 }

</bundles_post_ra>
